<compile_context>
chip_gen: v7x
topology: tpu7x:2x2x1
jax: 0.10.0
libtpu: 0.0.40
codegen_flags: <defaults>
</compile_context>

<pallas_src>
import jax
import jax.numpy as jnp
from jax.experimental import pallas as pl
from jax.experimental.pallas import tpu as pltpu

LANE = 128
H1 = 256
H2 = 512


def _leaky_relu(x, slope=0.2):
    # max(x, slope*x) == LeakyReLU(slope) for 0 < slope < 1 (2 VALU ops).
    return jnp.maximum(x, slope * x)


def generator_kernel(zt_ref, w1_ref, w2_ref, w3_ref, vec_ref, out_ref):
    # zt_ref: (B, latent_dim + text_dim) bf16 — concat fused in the wrapper.
    zt = zt_ref[...]
    out_pad = out_ref.shape[1]

    # Packed 1-row vectors (f32, zero padded to 512 columns):
    #   row 0: b1 (first 256 cols), row 1: gamma, row 2: beta, row 3: b3 (first out_pad cols)
    b1 = vec_ref[0:1, :H1]
    gamma = vec_ref[1:2, :]
    beta = vec_ref[2:3, :]
    b3 = vec_ref[3:4, :out_pad]

    # Linear(latent_dim + text_dim -> 256) + LeakyReLU(0.2). f32 MXU accumulation.
    h1 = jnp.dot(zt, w1_ref[...], preferred_element_type=jnp.float32) + b1
    h1 = _leaky_relu(h1)

    # Linear(256 -> 512). Bias omitted: it is exactly cancelled by the
    # BatchNorm mean subtraction below (per-feature constant).
    h2 = jnp.dot(h1.astype(jnp.bfloat16), w2_ref[...],
                 preferred_element_type=jnp.float32)

    # BatchNorm1d(512): training-mode batch statistics (biased var), eps=1e-5.
    # gamma folded into the normalization scale; all f32.
    mean = jnp.mean(h2, axis=0, keepdims=True)
    diff = h2 - mean
    var = jnp.mean(diff * diff, axis=0, keepdims=True)
    scale = gamma * jax.lax.rsqrt(var + 1e-5)        # (1, 512)
    h2n = diff * scale + beta

    # LeakyReLU(0.2)
    h2n = _leaky_relu(h2n)

    # Linear(512 -> out_pad) + Tanh. out_pad is a multiple of 128 (lane-dense,
    # unmasked stores); padded weight/bias columns are zero -> tanh(0) = 0.
    h3 = jnp.dot(h2n.astype(jnp.bfloat16), w3_ref[...],
                 preferred_element_type=jnp.float32) + b3
    out_ref[...] = jnp.tanh(h3)


def conditional_generator_forward(z, text_input, params, palette_size):
    """Runs the full MLP hot path inside one Pallas kernel invocation."""
    w1, w2, w3p, vec_pack = params

    B = z.shape[0]
    out_dim = palette_size * 3
    out_pad = w3p.shape[1]  # lane-dense padded width (multiple of 128)

    # torch.cat([z, text_input], dim=1), cast to bf16 for the MXU.
    zt = jnp.concatenate([z, text_input], axis=1).astype(jnp.bfloat16)

    def full_spec(shape):
        # every operand is small enough to live whole in VMEM; block = full array
        return pl.BlockSpec(shape, lambda: tuple(0 for _ in shape))

    operands = (zt, w1, w2, w3p, vec_pack)

    out_padded = pl.pallas_call(
        generator_kernel,
        out_shape=jax.ShapeDtypeStruct((B, out_pad), jnp.float32),
        in_specs=[full_spec(a.shape) for a in operands],
        out_specs=full_spec((B, out_pad)),
        compiler_params=pltpu.CompilerParams(vmem_limit_bytes=8 << 20),
    )(*operands)

    # strip lane padding, then reshape to (B, palette_size, 3)
    return out_padded[:, :out_dim].reshape(-1, palette_size, 3)


def init_params(key, latent_dim, text_dim, palette_size):
    """Deterministic synthetic parameters (shapes follow the nn.Sequential)."""
    in_dim = latent_dim + text_dim
    out_dim = palette_size * 3
    out_pad = ((out_dim + LANE - 1) // LANE) * LANE  # lane-dense output width

    k1, k2, k3 = jax.random.split(key, 3)

    # Linear(in_dim -> 256) weight, stored (in, out), bf16.
    w1 = (jax.random.normal(k1, (in_dim, H1), jnp.float32) * 0.05
          ).astype(jnp.bfloat16)
    b1 = jnp.zeros((H1,), jnp.float32)

    # Linear(256 -> 512) weight. Its bias is dropped (cancelled by BatchNorm).
    w2 = (jax.random.normal(k2, (H1, H2), jnp.float32) * 0.05
          ).astype(jnp.bfloat16)

    gamma = jnp.ones((H2,), jnp.float32)   # BatchNorm1d affine weight
    beta = jnp.zeros((H2,), jnp.float32)   # BatchNorm1d affine bias

    # Final linear, zero-padded to a 128-lane-aligned output width.
    w3 = jax.random.normal(k3, (H2, out_dim), jnp.float32) * 0.05
    w3p = jnp.zeros((H2, out_pad), jnp.float32).at[:, :out_dim].set(w3)
    w3p = w3p.astype(jnp.bfloat16)
    b3 = jnp.zeros((out_pad,), jnp.float32)

    # Pack all 1-row vectors into a single (4, 512) f32 operand:
    #   row 0: b1 (zero-padded to 512), row 1: gamma, row 2: beta,
    #   row 3: b3 (zero-padded to 512)
    vec_pack = jnp.zeros((4, H2), jnp.float32)
    vec_pack = vec_pack.at[0, :H1].set(b1)
    vec_pack = vec_pack.at[1, :].set(gamma)
    vec_pack = vec_pack.at[2, :].set(beta)
    vec_pack = vec_pack.at[3, :out_pad].set(b3)

    return (w1, w2, w3p, vec_pack)


if __name__ == "__main__":
    latent_dim = 16
    text_dim = 16
    palette_size = 8
    batch = 8

    key = jax.random.PRNGKey(0)
    kz, kt, kp = jax.random.split(key, 3)
    z = jax.random.normal(kz, (batch, latent_dim), jnp.float32)
    text_input = jax.random.normal(kt, (batch, text_dim), jnp.float32)
    params = init_params(kp, latent_dim, text_dim, palette_size)

    out = conditional_generator_forward(z, text_input, params, palette_size)
    out = jax.block_until_ready(out)

    assert out.shape == (batch, palette_size, 3), out.shape
    assert bool(jnp.all(jnp.isfinite(out)))
    assert bool(jnp.all(jnp.abs(out) <= 1.0))  # tanh range sanity check
    print("KERNEL_OK")
</pallas_src>

<mosaic_0001>
module attributes {stable_mosaic.version = 11 : i64} {
  func.func @generator_kernel(%arg0: memref<8x32xbf16, #tpu.memory_space<vmem>>, %arg1: memref<32x256xbf16, #tpu.memory_space<vmem>>, %arg2: memref<256x512xbf16, #tpu.memory_space<vmem>>, %arg3: memref<512x128xbf16, #tpu.memory_space<vmem>>, %arg4: memref<4x512xf32, #tpu.memory_space<vmem>>, %arg5: memref<8x128xf32, #tpu.memory_space<vmem>>) attributes {dimension_semantics = [], scalar_prefetch = 0 : i64, scratch_operands = 0 : i64, tpu.core_type = #tpu.core_type<tc>} {
    %c0 = arith.constant 0 : index
    %c0_0 = arith.constant 0 : index
    %0 = vector.load %arg0[%c0, %c0_0] : memref<8x32xbf16, #tpu.memory_space<vmem>>, vector<8x32xbf16>
    %c0_1 = arith.constant 0 : index
    %c0_2 = arith.constant 0 : index
    %1 = vector.load %arg4[%c0_1, %c0_2] : memref<4x512xf32, #tpu.memory_space<vmem>>, vector<1x256xf32>
    %c1 = arith.constant 1 : index
    %c0_3 = arith.constant 0 : index
    %2 = vector.load %arg4[%c1, %c0_3] : memref<4x512xf32, #tpu.memory_space<vmem>>, vector<1x512xf32>
    %c2 = arith.constant 2 : index
    %c0_4 = arith.constant 0 : index
    %3 = vector.load %arg4[%c2, %c0_4] : memref<4x512xf32, #tpu.memory_space<vmem>>, vector<1x512xf32>
    %c3 = arith.constant 3 : index
    %c0_5 = arith.constant 0 : index
    %4 = vector.load %arg4[%c3, %c0_5] : memref<4x512xf32, #tpu.memory_space<vmem>>, vector<1x128xf32>
    %c0_6 = arith.constant 0 : index
    %c0_7 = arith.constant 0 : index
    %5 = vector.load %arg1[%c0_6, %c0_7] : memref<32x256xbf16, #tpu.memory_space<vmem>>, vector<32x256xbf16>
    %cst = arith.constant dense<0.000000e+00> : vector<8x256xf32>
    %6 = tpu.matmul %0, %5, %cst {dimension_numbers = #tpu.dot_dimension_numbers<[1], [0], [0], [1], [0, 0, 1, 1], [], []>} : vector<8x32xbf16>, vector<32x256xbf16>, vector<8x256xf32> -> vector<8x256xf32>
    %7 = vector.broadcast %1 : vector<1x256xf32> to vector<8x256xf32>
    %8 = arith.addf %6, %7 : vector<8x256xf32>
    %cst_8 = arith.constant 2.000000e-01 : f32
    %9 = vector.broadcast %cst_8 : f32 to vector<8x256xf32>
    %10 = arith.mulf %9, %8 : vector<8x256xf32>
    %11 = arith.maximumf %8, %10 : vector<8x256xf32>
    %12 = arith.truncf %11 : vector<8x256xf32> to vector<8x256xbf16>
    %c0_9 = arith.constant 0 : index
    %c0_10 = arith.constant 0 : index
    %13 = vector.load %arg2[%c0_9, %c0_10] : memref<256x512xbf16, #tpu.memory_space<vmem>>, vector<256x512xbf16>
    %cst_11 = arith.constant dense<0.000000e+00> : vector<8x512xf32>
    %14 = tpu.matmul %12, %13, %cst_11 {dimension_numbers = #tpu.dot_dimension_numbers<[1], [0], [0], [1], [0, 0, 1, 1], [], []>} : vector<8x256xbf16>, vector<256x512xbf16>, vector<8x512xf32> -> vector<8x512xf32>
    %cst_12 = arith.constant dense<0.000000e+00> : vector<512xf32>
    %15 = vector.multi_reduction <add>, %14, %cst_12 [0] : vector<8x512xf32> to vector<512xf32>
    %16 = vector.shape_cast %15 : vector<512xf32> to vector<1x512xf32>
    %cst_13 = arith.constant 8.000000e+00 : f32
    %17 = vector.broadcast %cst_13 : f32 to vector<1x512xf32>
    %18 = arith.divf %16, %17 : vector<1x512xf32>
    %19 = vector.broadcast %18 : vector<1x512xf32> to vector<8x512xf32>
    %20 = arith.subf %14, %19 : vector<8x512xf32>
    %21 = arith.mulf %20, %20 : vector<8x512xf32>
    %cst_14 = arith.constant dense<0.000000e+00> : vector<512xf32>
    %22 = vector.multi_reduction <add>, %21, %cst_14 [0] : vector<8x512xf32> to vector<512xf32>
    %23 = vector.shape_cast %22 : vector<512xf32> to vector<1x512xf32>
    %cst_15 = arith.constant 8.000000e+00 : f32
    %24 = vector.broadcast %cst_15 : f32 to vector<1x512xf32>
    %25 = arith.divf %23, %24 : vector<1x512xf32>
    %cst_16 = arith.constant 9.99999974E-6 : f32
    %26 = vector.broadcast %cst_16 : f32 to vector<1x512xf32>
    %27 = arith.addf %25, %26 : vector<1x512xf32>
    %28 = math.rsqrt %27 : vector<1x512xf32>
    %29 = arith.mulf %2, %28 : vector<1x512xf32>
    %30 = vector.broadcast %29 : vector<1x512xf32> to vector<8x512xf32>
    %31 = arith.mulf %20, %30 : vector<8x512xf32>
    %32 = vector.broadcast %3 : vector<1x512xf32> to vector<8x512xf32>
    %33 = arith.addf %31, %32 : vector<8x512xf32>
    %cst_17 = arith.constant 2.000000e-01 : f32
    %34 = vector.broadcast %cst_17 : f32 to vector<8x512xf32>
    %35 = arith.mulf %34, %33 : vector<8x512xf32>
    %36 = arith.maximumf %33, %35 : vector<8x512xf32>
    %37 = arith.truncf %36 : vector<8x512xf32> to vector<8x512xbf16>
    %c0_18 = arith.constant 0 : index
    %c0_19 = arith.constant 0 : index
    %38 = vector.load %arg3[%c0_18, %c0_19] : memref<512x128xbf16, #tpu.memory_space<vmem>>, vector<512x128xbf16>
    %cst_20 = arith.constant dense<0.000000e+00> : vector<8x128xf32>
    %39 = tpu.matmul %37, %38, %cst_20 {dimension_numbers = #tpu.dot_dimension_numbers<[1], [0], [0], [1], [0, 0, 1, 1], [], []>} : vector<8x512xbf16>, vector<512x128xbf16>, vector<8x128xf32> -> vector<8x128xf32>
    %40 = vector.broadcast %4 : vector<1x128xf32> to vector<8x128xf32>
    %41 = arith.addf %39, %40 : vector<8x128xf32>
    %42 = math.tanh %41 : vector<8x128xf32>
    %c0_21 = arith.constant 0 : index
    %c0_22 = arith.constant 0 : index
    %43 = vector.load %arg5[%c0_21, %c0_22] : memref<8x128xf32, #tpu.memory_space<vmem>>, vector<8x128xf32>
    tpu.vector_store %arg5[%c0_21, %c0_22], %42 {strides = array<i32>} : memref<8x128xf32, #tpu.memory_space<vmem>>, vector<8x128xf32>,
    return
  }
}

</mosaic_0001>

<bundles_post_ra>
// kernel: tpu_custom_call.1
= control target key start
LH: loop header
LB: loop body
LE: loop exit
PB: predicated region body
PF: predicated region fallthrough
CT: control target
= control target key end

     0   :  { %10 = vsyncpa [#allocation3], 0  ;;  %s1773_s0 = inlined_call_operand.hbm [shape: bf16[8,32], index: 0, kind: input, shape index: {}]   ;;  %s1774_s1 = inlined_call_operand.hbm [shape: bf16[32,256], index: 1, kind: input, shape index: {}]   ;;  %s1775_s2 = inlined_call_operand.hbm [shape: bf16[256,512], index: 2, kind: input, shape index: {}]   ;;  %s1776_s3 = inlined_call_operand.hbm [shape: bf16[512,128], index: 3, kind: input, shape index: {}]   ;;  %s1777_s4 = inlined_call_operand.hbm [shape: f32[4,512], index: 4, kind: input, shape index: {}]   ;;  %s1778_s5 = inlined_call_operand.hbm [shape: f32[8,128], index: 5, kind: output, shape index: {}]  }
   0x1   :  { %11 = vsyncpa [#allocation6], 0 }
   0x2   :  { %12 = vsyncpa [#allocation9], 0 }
   0x3   :  { %13 = vsyncpa [#allocation4], 0  ;;  %s1613_s18 = smov [#allocation5]   ;;  %s1473_s22 = scalar_lea.hbm %s1774_s1, 512 }
   0x4   :  { %s29_s19 = sshll.u32 %s1613_s18, 4  ;;  %p1474_p0 = scmp.ne.s32.totalorder %s1774_s1, %s1473_s22  ;;  %s30_s19 = int_to_ptr.vmem [resolvable:$true] %s29_s19 }
   0x5   :  { %p1477_p1 = scmp.lt.u32.totalorder %s1473_s22, %s1774_s1 }
   0x7   :  { %p1479_p2 = pnand %p1477_p1, %p1474_p0 }
   0x9   :  { %1482 = shalt.err (!%p1479_p2)
}
   0xa   :  { %s1483_s27 = scalar_lea.vmem %s30_s19, 512  ;;  %p1488_p4 = scmp.lt.s32.totalorder %s30_s19, %s30_s19 }
   0xb   :  { %p1484_p3 = scmp.ne.s32.totalorder %s30_s19, %s1483_s27  ;;  %p1489_p5 = scmp.lt.s32.totalorder %s1483_s27, %s1483_s27 }
   0xd   :  { %p1490_p6 = por %p1489_p5, %p1488_p4 }
   0xf   :  { %p1491_p7 = pnand %p1490_p6, %p1484_p3 }
  0x11   :  { %1494 = shalt.err (!%p1491_p7)
}
  0x12   :  { %s1614_s28 = smov 128   ;;  %s1615_s29 = smov 8  }
  0x13   :  { %35 = dma.hbm_to_vmem [thread:$0]  %s1774_s1, 512, %s30_s19, [#allocation6], %s1614_s28, %s1614_s28, %s1615_s29  }
  0x14   :  { %s1616_s7 = smov [#allocation8]   ;;  %s1495_s11 = scalar_lea.hbm %s1776_s3, 4096 }
  0x15   :  { %s53_s8 = sshll.u32 %s1616_s7, 4  ;;  %p1496_p8 = scmp.ne.s32.totalorder %s1776_s3, %s1495_s11  ;;  %s54_s8 = int_to_ptr.vmem [resolvable:$true] %s53_s8 }
  0x16   :  { %p1499_p9 = scmp.lt.u32.totalorder %s1495_s11, %s1776_s3 }
  0x18   :  { %p1501_p10 = pnand %p1499_p9, %p1496_p8 }
  0x1a   :  { %1504 = shalt.err (!%p1501_p10)
}
  0x1b   :  { %s1505_s16 = scalar_lea.vmem %s54_s8, 4096  ;;  %p1510_p12 = scmp.lt.s32.totalorder %s54_s8, %s54_s8 }
  0x1c   :  { %p1506_p11 = scmp.ne.s32.totalorder %s54_s8, %s1505_s16  ;;  %p1511_p13 = scmp.lt.s32.totalorder %s1505_s16, %s1505_s16 }
  0x1e   :  { %p1512_p0 = por %p1511_p13, %p1510_p12 }
  0x20   :  { %p1513_p1 = pnand %p1512_p0, %p1506_p11 }
  0x22   :  { %1516 = shalt.err (!%p1513_p1)
}
  0x23   :  { %s1617_s1 = smov 64   ;;  %s1618_s17 = smov 4  }
  0x24   :  { %59 = dma.hbm_to_vmem [thread:$0]  %s1776_s3, 4096, %s54_s8, [#allocation9], %s1617_s1, %s1617_s1, %s1618_s17  }
  0x25   :  { %s1619_s20 = smov [#allocation2]   ;;  %s1620_s22 = smov [#allocation7]  }
  0x26   :  { %s20_s21 = sshll.u32 %s1619_s20, 4  ;;  %s41_s23 = sshll.u32 %s1620_s22, 4  ;;  %s21_s21 = int_to_ptr.vmem [resolvable:$true] %s20_s21  ;;  %s1681_s23 = int_to_ptr.vmem [resolvable:$true] %s41_s23 }
  0x27   :  { %s1517_s26 = scalar_lea.hbm %s1773_s0, 64 }
  0x28   :  { %p1518_p2 = scmp.ne.s32.totalorder %s1773_s0, %s1517_s26  ;;  %p1521_p3 = scmp.lt.u32.totalorder %s1517_s26, %s1773_s0 }
  0x2a   :  { %p1523_p4 = pnand %p1521_p3, %p1518_p2 }
  0x2c   :  { %1526 = shalt.err (!%p1523_p4)
}
  0x2d   :  { %s1527_s3 = scalar_lea.vmem %s21_s21, 64  ;;  %p1532_p6 = scmp.lt.s32.totalorder %s21_s21, %s21_s21 }
  0x2e   :  { %p1528_p5 = scmp.ne.s32.totalorder %s21_s21, %s1527_s3  ;;  %p1533_p7 = scmp.lt.s32.totalorder %s1527_s3, %s1527_s3 }
  0x30   :  { %p1534_p8 = por %p1533_p7, %p1532_p6 }
  0x32   :  { %p1535_p9 = pnand %p1534_p8, %p1528_p5 }
  0x34   :  { %1538 = shalt.err (!%p1535_p9)
}
  0x35   :  { %23 = dma.hbm_to_vmem [thread:$0]  %s1773_s0, 64, %s21_s21, [#allocation3]  }
  0x36   :  { %s1539_s10 = scalar_lea.hbm %s1775_s2, 8192 }
  0x37   :  { %p1540_p10 = scmp.ne.s32.totalorder %s1775_s2, %s1539_s10  ;;  %p1543_p11 = scmp.lt.u32.totalorder %s1539_s10, %s1775_s2 }
  0x39   :  { %p1545_p12 = pnand %p1543_p11, %p1540_p10 }
  0x3b   :  { %1548 = shalt.err (!%p1545_p12)
}
  0x3c   :  { %s1549_s15 = scalar_lea.vmem %s1681_s23, 8192  ;;  %p1554_p0 = scmp.lt.s32.totalorder %s1681_s23, %s1681_s23 }
  0x3d   :  { %p1550_p13 = scmp.ne.s32.totalorder %s1681_s23, %s1549_s15  ;;  %p1555_p1 = scmp.lt.s32.totalorder %s1549_s15, %s1549_s15 }
  0x3f   :  { %p1556_p2 = por %p1555_p1, %p1554_p0 }
  0x41   :  { %p1557_p3 = pnand %p1556_p2, %p1550_p13 }
  0x43   :  { %1560 = shalt.err (!%p1557_p3)
}
  0x44   :  { %s1621_s0 = smov 256   ;;  %s1622_s16 = smov 16  }
  0x45   :  { %47 = dma.hbm_to_vmem [thread:$0]  %s1775_s2, 8192, %s1681_s23, [#allocation6], %s1621_s0, %s1621_s0, %s1622_s16  }
  0x46   :  { %s1623_s18 = smov [#allocation10]   ;;  %s1561_s22 = scalar_lea.hbm %s1777_s4, 256 }
  0x47   :  { %s66_s19 = sshll.u32 %s1623_s18, 4  ;;  %p1562_p4 = scmp.ne.s32.totalorder %s1777_s4, %s1561_s22  ;;  %s67_s19 = int_to_ptr.vmem [resolvable:$true] %s66_s19 }
  0x48   :  { %p1565_p5 = scmp.lt.u32.totalorder %s1561_s22, %s1777_s4 }
  0x4a   :  { %p1567_p6 = pnand %p1565_p5, %p1562_p4 }
  0x4c   :  { %1570 = shalt.err (!%p1567_p6)
}
  0x4d   :  { %s1571_s28 = scalar_lea.vmem %s67_s19, 256  ;;  %p1576_p8 = scmp.lt.s32.totalorder %s67_s19, %s67_s19 }
  0x4e   :  { %p1572_p7 = scmp.ne.s32.totalorder %s67_s19, %s1571_s28  ;;  %p1577_p9 = scmp.lt.s32.totalorder %s1571_s28, %s1571_s28 }
  0x50   :  { %p1578_p10 = por %p1577_p9, %p1576_p8 }
  0x52   :  { %p1579_p11 = pnand %p1578_p10, %p1572_p7 }
  0x54   :  { %1582 = shalt.err (!%p1579_p11)
}
  0x55   :  { %69 = dma.hbm_to_vmem [thread:$0]  %s1777_s4, 256, %s67_s19, [#allocation9]  }
  0x56   :  { %1605 = dma.done.wait [#allocation3], 64  }
  0x57   :  { %1606 = vsyncadd [#allocation3], 4294967232 }
  0x58   :  { %1607 = dma.done.wait [#allocation6], 8704  }
  0x59   :  { %1608 = vsyncadd [#allocation6], 4294958592 }
  0x5a   :  { %1609 = dma.done.wait [#allocation9], 4352  }
  0x5b   :  { %1610 = vsyncadd [#allocation9], 4294962944  ;;  %v1624_v0 = vmov 0   ;;  %v1329_v1 = vld [vmem:[#allocation5 + $0x4] ss:$8 sps:$4 sm:$0xff]   ;;  %vm128_vm0 = vcmask 261120  }
  0x5c   :  { %164 = vmatprep.mubr.bf16.mxu0 %v1624_v0  ;;  %v1331_v2 = vld [vmem:[#allocation5] ss:$8 sps:$4 sm:$0xff]   ;;  %132 = vmatprep.subr.bf16.mxu0 %v1329_v1  ;;  %v1332_v3 = vld [vmem:[#allocation5 + $0x14] ss:$8 sps:$4 sm:$0xff]   ;;  %v1334_v4 = vld [vmem:[#allocation5 + $0x10] ss:$8 sps:$4 sm:$0xff]  }
  0x5d   :  { %133 = vmatpush1.bf16.msra.mxu0 %v1331_v2  ;;  %v1335_v5 = vld [vmem:[#allocation7 + $0x4] ss:$16 sps:$4 sm:$0xff]   ;;  %v86_v6 = vld [vmem:[#allocation2] sm:$0xf]  ;;  %v1340_v8 = vld [vmem:[#allocation7] ss:$16 sps:$4 sm:$0xff]  }
  0x5e   :  { %134 = vmatprep.subr.bf16.mxu0 %v1332_v3  ;;  %563 = vmatprep.subr.bf16.mxu1 %v1335_v5  ;;  %v1339_v7 = vld [vmem:[#allocation7 + $0xc] ss:$16 sps:$4 sm:$0xff]   ;;  %v1341_v9 = vld [vmem:[#allocation7 + $0x24] ss:$16 sps:$4 sm:$0xff]   ;;  %v1337_v10 = vld [vmem:[#allocation7 + $0x8] ss:$16 sps:$4 sm:$0xff]  }
  0x5f   :  { %564 = vmatpush1.bf16.msra.mxu1 %v1340_v8  ;;  %v1345_v11 = vld [vmem:[#allocation7 + $0x2c] ss:$16 sps:$4 sm:$0xff]   ;;  %v1346_v12 = vld [vmem:[#allocation7 + $0x20] ss:$16 sps:$4 sm:$0xff]   ;;  %v1347_v13 = vld [vmem:[#allocation7 + $0x44] ss:$16 sps:$4 sm:$0xff]  }
  0x60   :  { %565 = vmatprep.subr.bf16.mxu1 %v1341_v9  ;;  %v1343_v14 = vld [vmem:[#allocation7 + $0x28] ss:$16 sps:$4 sm:$0xff]   ;;  %v1351_v15 = vld [vmem:[#allocation7 + $0x4c] ss:$16 sps:$4 sm:$0xff]   ;;  %v1352_v16 = vld [vmem:[#allocation7 + $0x40] ss:$16 sps:$4 sm:$0xff]  }
  0x61   :  { %135 = vmatpush1.bf16.msra.mxu0 %v1334_v4  ;;  %v1353_v17 = vld [vmem:[#allocation7 + $0x64] ss:$16 sps:$4 sm:$0xff]   ;;  %v1349_v18 = vld [vmem:[#allocation7 + $0x48] ss:$16 sps:$4 sm:$0xff]   ;;  %v1357_v19 = vld [vmem:[#allocation7 + $0x6c] ss:$16 sps:$4 sm:$0xff]  }
  0x62   :  { %604 = vmatprep.subr.bf16.mxu0 %v1339_v7  ;;  %v1358_v20 = vld [vmem:[#allocation7 + $0x60] ss:$16 sps:$4 sm:$0xff]   ;;  %v1359_v21 = vld [vmem:[#allocation7 + $0x84] ss:$16 sps:$4 sm:$0xff]   ;;  %v1355_v22 = vld [vmem:[#allocation7 + $0x68] ss:$16 sps:$4 sm:$0xff]  }
  0x63   :  { %566 = vmatpush1.bf16.msra.mxu1 %v1346_v12  ;;  %v1363_v23 = vld [vmem:[#allocation7 + $0x8c] ss:$16 sps:$4 sm:$0xff]   ;;  %v1364_v24 = vld [vmem:[#allocation7 + $0x80] ss:$16 sps:$4 sm:$0xff]   ;;  %v1365_v25 = vld [vmem:[#allocation7 + $0xa4] ss:$16 sps:$4 sm:$0xff]  }
  0x64   :  { %1173 = vmatmul.mubr.msk.bf16.vlgmr.msra.gmra.mrb[0].mxu0 %vm128_vm0, %v86_v6  ;;  %567 = vmatprep.subr.bf16.mxu1 %v1347_v13  ;;  %v1361_v26 = vld [vmem:[#allocation7 + $0x88] ss:$16 sps:$4 sm:$0xff]   ;;  %v1369_v27 = vld [vmem:[#allocation7 + $0xac] ss:$16 sps:$4 sm:$0xff]   ;;  %v1370_v28 = vld [vmem:[#allocation7 + $0xa0] ss:$16 sps:$4 sm:$0xff]   ;;  %v98_v6 = vlaneseq }
  0x65   :  { %605 = vmatpush1.bf16.msra.mxu0 %v1337_v10  ;;  %v1371_v29 = vld [vmem:[#allocation7 + $0xc4] ss:$16 sps:$4 sm:$0xff]   ;;  %v1367_v30 = vld [vmem:[#allocation7 + $0xa8] ss:$16 sps:$4 sm:$0xff]   ;;  %v1375_v31 = vld [vmem:[#allocation7 + $0xcc] ss:$16 sps:$4 sm:$0xff]  }
  0x66   :  { %606 = vmatprep.subr.bf16.mxu0 %v1345_v11  ;;  %v1376_v32 = vld [vmem:[#allocation7 + $0xc0] ss:$16 sps:$4 sm:$0xff]   ;;  %v1377_v33 = vld [vmem:[#allocation7 + $0xe4] ss:$16 sps:$4 sm:$0xff]   ;;  %v1373_v34 = vld [vmem:[#allocation7 + $0xc8] ss:$16 sps:$4 sm:$0xff]  }
  0x67   :  { %568 = vmatpush1.bf16.msra.mxu1 %v1352_v16  ;;  %v1381_v35 = vld [vmem:[#allocation7 + $0xec] ss:$16 sps:$4 sm:$0xff]   ;;  %v1382_v36 = vld [vmem:[#allocation7 + $0xe0] ss:$16 sps:$4 sm:$0xff]   ;;  %v1383_v37 = vld [vmem:[#allocation7 + $0x104] ss:$16 sps:$4 sm:$0xff]  }
  0x68   :  { %569 = vmatprep.subr.bf16.mxu1 %v1353_v17  ;;  %v1379_v38 = vld [vmem:[#allocation7 + $0xe8] ss:$16 sps:$4 sm:$0xff]   ;;  %v1387_v39 = vld [vmem:[#allocation7 + $0x10c] ss:$16 sps:$4 sm:$0xff]   ;;  %v1388_v40 = vld [vmem:[#allocation7 + $0x100] ss:$16 sps:$4 sm:$0xff]  }
  0x69   :  { %607 = vmatpush1.bf16.msra.mxu0 %v1343_v14  ;;  %v1389_v41 = vld [vmem:[#allocation7 + $0x124] ss:$16 sps:$4 sm:$0xff]   ;;  %v1385_v42 = vld [vmem:[#allocation7 + $0x108] ss:$16 sps:$4 sm:$0xff]   ;;  %v1394_v43 = vld [vmem:[#allocation7 + $0x120] ss:$16 sps:$4 sm:$0xff]  }
  0x6a   :  { %608 = vmatprep.subr.bf16.mxu0 %v1351_v15  ;;  %v1393_v44 = vld [vmem:[#allocation7 + $0x12c] ss:$16 sps:$4 sm:$0xff]   ;;  %v1395_v45 = vld [vmem:[#allocation7 + $0x144] ss:$16 sps:$4 sm:$0xff]   ;;  %v1391_v46 = vld [vmem:[#allocation7 + $0x128] ss:$16 sps:$4 sm:$0xff]  }
  0x6b   :  { %570 = vmatpush1.bf16.msra.mxu1 %v1358_v20  ;;  %v1400_v47 = vld [vmem:[#allocation7 + $0x140] ss:$16 sps:$4 sm:$0xff]   ;;  %v1399_v48 = vld [vmem:[#allocation7 + $0x14c] ss:$16 sps:$4 sm:$0xff]   ;;  %v1401_v49 = vld [vmem:[#allocation7 + $0x164] ss:$16 sps:$4 sm:$0xff]  }
  0x6c   :  { %571 = vmatprep.subr.bf16.mxu1 %v1359_v21  ;;  %v1397_v50 = vld [vmem:[#allocation7 + $0x148] ss:$16 sps:$4 sm:$0xff]   ;;  %v1406_v51 = vld [vmem:[#allocation7 + $0x160] ss:$16 sps:$4 sm:$0xff]   ;;  %v1405_v52 = vld [vmem:[#allocation7 + $0x16c] ss:$16 sps:$4 sm:$0xff]  }
  0x6d   :  { %609 = vmatpush1.bf16.msra.mxu0 %v1349_v18  ;;  %v1407_v53 = vld [vmem:[#allocation7 + $0x184] ss:$16 sps:$4 sm:$0xff]   ;;  %v1403_v54 = vld [vmem:[#allocation7 + $0x168] ss:$16 sps:$4 sm:$0xff]   ;;  %v1412_v55 = vld [vmem:[#allocation7 + $0x180] ss:$16 sps:$4 sm:$0xff]  }
  0x6e   :  { %610 = vmatprep.subr.bf16.mxu0 %v1357_v19  ;;  %v1411_v56 = vld [vmem:[#allocation7 + $0x18c] ss:$16 sps:$4 sm:$0xff]   ;;  %v1413_v57 = vld [vmem:[#allocation7 + $0x1a4] ss:$16 sps:$4 sm:$0xff]   ;;  %v1409_v58 = vld [vmem:[#allocation7 + $0x188] ss:$16 sps:$4 sm:$0xff]  }
  0x6f   :  { %572 = vmatpush1.bf16.msra.mxu1 %v1364_v24  ;;  %v1417_v59 = vld [vmem:[#allocation7 + $0x1ac] ss:$16 sps:$4 sm:$0xff]   ;;  %v1415_v60 = vld [vmem:[#allocation7 + $0x1a8] ss:$16 sps:$4 sm:$0xff]   ;;  %v1418_v61 = vld [vmem:[#allocation7 + $0x1a0] ss:$16 sps:$4 sm:$0xff]  }
  0x70   :  { %573 = vmatprep.subr.bf16.mxu1 %v1365_v25  ;;  %v1419_v62 = vld [vmem:[#allocation7 + $0x1c4] ss:$16 sps:$4 sm:$0xff]   ;;  %v1423_v63 = vld [vmem:[#allocation7 + $0x1cc] ss:$16 sps:$4 sm:$0xff]   ;;  %v1421_v0 = vld [vmem:[#allocation7 + $0x1c8] ss:$16 sps:$4 sm:$0xff]  }
  0x71   :  { %611 = vmatpush1.bf16.msra.mxu0 %v1355_v22  ;;  %v1424_v1 = vld [vmem:[#allocation7 + $0x1c0] ss:$16 sps:$4 sm:$0xff]   ;;  %v1425_v2 = vld [vmem:[#allocation7 + $0x1e4] ss:$16 sps:$4 sm:$0xff]   ;;  %v1429_v3 = vld [vmem:[#allocation7 + $0x1ec] ss:$16 sps:$4 sm:$0xff]  }
  0x72   :  { %612 = vmatprep.subr.bf16.mxu0 %v1363_v23  ;;  %v1427_v4 = vld [vmem:[#allocation7 + $0x1e8] ss:$16 sps:$4 sm:$0xff]   ;;  %v1430_v5 = vld [vmem:[#allocation7 + $0x1e0] ss:$16 sps:$4 sm:$0xff]   ;;  %v1724_v7 = vshrl.u32 %v98_v6, 7  ;;  %s1626_s4 = smov [#allocation11]  }
  0x73   :  { %574 = vmatpush1.bf16.msra.mxu1 %v1370_v28  ;;  %v87_v9 = vld [vmem:[#allocation10] ss:$4 sm:$0x3]  ;;  %s1158_s29 = sshll.u32 %s1626_s4, 4  ;;  %s1159_s29 = int_to_ptr.vmem [resolvable:$true] %s1158_s29 }
  0x74   :  { %575 = vmatprep.subr.bf16.mxu1 %v1371_v29  ;;  %v1727_v8 = vsub.s32 0, %v1724_v7  ;;  %v1730_v10 = vsub.s32 1, %v1724_v7  ;;  %v1431_v25 = vld [vmem:[#allocation8 + $0x40] sm:$0xff]   ;;  %v1435_v29 = vld [vmem:[#allocation8 + $0x48] sm:$0xff]   ;;  %s1583_s30 = scalar_lea.vmem %s1159_s29, 128  ;;  %p1588_p13 = scmp.lt.s32.totalorder %s1159_s29, %s1159_s29 }
  0x75   :  { %613 = vmatpush1.bf16.msra.mxu0 %v1361_v26  ;;  %v1432_v26 = vld [vmem:[#allocation8 + $0xc0] sm:$0xff]   ;;  %p1584_p12 = scmp.ne.s32.totalorder %s1159_s29, %s1583_s30  ;;  %p1589_p0 = scmp.lt.s32.totalorder %s1583_s30, %s1583_s30 }
  0x76   :  { %614 = vmatprep.subr.bf16.mxu0 %v1369_v27  ;;  %v101_v11 = vrot.slane %v87_v9, %v1727_v8  ;;  %v105_v12 = vrot.slane %v87_v9, %v1730_v10  ;;  %v1433_v27 = vld [vmem:[#allocation8] sm:$0xff]  }
  0x77   :  { %576 = vmatpush1.bf16.msra.mxu1 %v1376_v32  ;;  %v1434_v28 = vld [vmem:[#allocation8 + $0x80] sm:$0xff]   ;;  %v1438_v32 = vld [vmem:[#allocation8 + $0x88] sm:$0xff]   ;;  %p1590_p1 = por %p1589_p0, %p1588_p13 }
  0x78   :  { %577 = vmatprep.subr.bf16.mxu1 %v1377_v33  ;;  %v1439_v33 = vld [vmem:[#allocation8 + $0x50] sm:$0xff]  }
  0x79   :  { %615 = vmatpush1.bf16.msra.mxu0 %v1367_v30  ;;  %v1436_v30 = vld [vmem:[#allocation8 + $0xc8] sm:$0xff]   ;;  %p1591_p2 = pnand %p1590_p1, %p1584_p12 }
  0x7a   :  { %616 = vmatprep.subr.bf16.mxu0 %v1375_v31  ;;  %v1437_v31 = vld [vmem:[#allocation8 + $0x8] sm:$0xff]  }
  0x7b   :  { %578 = vmatpush1.bf16.msra.mxu1 %v1382_v36  ;;  %v1442_v36 = vld [vmem:[#allocation8 + $0x90] sm:$0xff]  }
  0x7c   :  { %579 = vmatprep.subr.bf16.mxu1 %v1383_v37  ;;  %v1443_v37 = vld [vmem:[#allocation8 + $0x58] sm:$0xff]  }
  0x7d   :  { %617 = vmatpush1.bf16.msra.mxu0 %v1373_v34  ;;  %v1440_v34 = vld [vmem:[#allocation8 + $0xd0] sm:$0xff]  }
  0x7e   :  { %618 = vmatprep.subr.bf16.mxu0 %v1381_v35  ;;  %v1441_v35 = vld [vmem:[#allocation8 + $0x10] sm:$0xff]  }
  0x7f   :  { %580 = vmatpush1.bf16.msra.mxu1 %v1388_v40  ;;  %v1446_v40 = vld [vmem:[#allocation8 + $0x98] sm:$0xff]  }
  0x80   :  { %581 = vmatprep.subr.bf16.mxu1 %v1389_v41  ;;  %v1447_v41 = vld [vmem:[#allocation8 + $0x60] sm:$0xff]  }
  0x81   :  { %619 = vmatpush1.bf16.msra.mxu0 %v1379_v38  ;;  %v1444_v38 = vld [vmem:[#allocation8 + $0xd8] sm:$0xff]  }
  0x82   :  { %620 = vmatprep.subr.bf16.mxu0 %v1387_v39  ;;  %v1445_v39 = vld [vmem:[#allocation8 + $0x18] sm:$0xff]  }
  0x83   :  { %582 = vmatpush1.bf16.msra.mxu1 %v1394_v43  ;;  %v1449_v43 = vld [vmem:[#allocation8 + $0x20] sm:$0xff]  }
  0x84   :  { %583 = vmatprep.subr.bf16.mxu1 %v1395_v45  ;;  %v1451_v45 = vld [vmem:[#allocation8 + $0x68] sm:$0xff]  }
  0x85   :  { %621 = vmatpush1.bf16.msra.mxu0 %v1385_v42  ;;  %v1448_v42 = vld [vmem:[#allocation8 + $0xe0] sm:$0xff]  }
  0x86   :  { %622 = vmatprep.subr.bf16.mxu0 %v1393_v44  ;;  %v1450_v44 = vld [vmem:[#allocation8 + $0xa0] sm:$0xff]  }
  0x87   :  { %584 = vmatpush1.bf16.msra.mxu1 %v1400_v47  ;;  %v1453_v47 = vld [vmem:[#allocation8 + $0x28] sm:$0xff]  }
  0x88   :  { %585 = vmatprep.subr.bf16.mxu1 %v1401_v49  ;;  %v1455_v49 = vld [vmem:[#allocation8 + $0x70] sm:$0xff]  }
  0x89   :  { %623 = vmatpush1.bf16.msra.mxu0 %v1391_v46  ;;  %v1452_v46 = vld [vmem:[#allocation8 + $0xe8] sm:$0xff]  }
  0x8a   :  { %624 = vmatprep.subr.bf16.mxu0 %v1399_v48  ;;  %v1454_v48 = vld [vmem:[#allocation8 + $0xa8] sm:$0xff]  }
  0x8b   :  { %586 = vmatpush1.bf16.msra.mxu1 %v1406_v51  ;;  %v1457_v51 = vld [vmem:[#allocation8 + $0x30] sm:$0xff]  }
  0x8c   :  { %587 = vmatprep.subr.bf16.mxu1 %v1407_v53  ;;  %v1459_v53 = vld [vmem:[#allocation8 + $0x78] sm:$0xff]  }
  0x8d   :  { %625 = vmatpush1.bf16.msra.mxu0 %v1397_v50  ;;  %v1456_v50 = vld [vmem:[#allocation8 + $0xf0] sm:$0xff]  }
  0x8e   :  { %626 = vmatprep.subr.bf16.mxu0 %v1405_v52  ;;  %v1458_v52 = vld [vmem:[#allocation8 + $0xb0] sm:$0xff]  }
  0x8f   :  { %588 = vmatpush1.bf16.msra.mxu1 %v1412_v55  ;;  %v1461_v55 = vld [vmem:[#allocation8 + $0x38] sm:$0xff]  }
  0x90   :  { %589 = vmatprep.subr.bf16.mxu1 %v1413_v57 }
  0x91   :  { %627 = vmatpush1.bf16.msra.mxu0 %v1403_v54  ;;  %v1460_v54 = vld [vmem:[#allocation8 + $0xf8] sm:$0xff]  }
  0x92   :  { %628 = vmatprep.subr.bf16.mxu0 %v1411_v56  ;;  %v1462_v56 = vld [vmem:[#allocation8 + $0xb8] sm:$0xff]  }
  0x93   :  { %590 = vmatpush1.bf16.msra.mxu1 %v1418_v61 }
  0x94   :  { %591 = vmatprep.subr.bf16.mxu1 %v1419_v62 }
  0x95   :  { %629 = vmatpush1.bf16.msra.mxu0 %v1409_v58 }
  0x96   :  { %630 = vmatprep.subr.bf16.mxu0 %v1417_v59 }
  0x97   :  { %592 = vmatpush1.bf16.msra.mxu1 %v1424_v1 }
  0x98   :  { %593 = vmatprep.subr.bf16.mxu1 %v1425_v2 }
  0x99   :  { %631 = vmatpush1.bf16.msra.mxu0 %v1415_v60 }
  0x9a   :  { %632 = vmatprep.subr.bf16.mxu0 %v1423_v63 }
  0x9b   :  { %594 = vmatpush1.bf16.msra.mxu1 %v1430_v5 }
  0x9c   :  { %1271 = vmatprep.subr.bf16.mxu1 %v1431_v25 }
  0x9d   :  { %633 = vmatpush1.bf16.msra.mxu0 %v1421_v0 }
  0x9e   :  { %634 = vmatprep.subr.bf16.mxu0 %v1429_v3 }
  0xa1   :  { %635 = vmatpush1.bf16.msra.mxu0 %v1427_v4 }
  0xa2   :  { %1293 = vmatprep.subr.bf16.mxu0 %v1432_v26 }
 0x137   :  { %v166_v13 = vpop.f32.mrb[0].mxu0 }
 0x138   :  { %v167_v14 = vadd.f32 %v166_v13, %v101_v11  ;;  %v168_v15 = vpop.f32.mrb[1].mxu0 }
 0x139   :  { %v169_v16 = vadd.f32 %v168_v15, %v105_v12  ;;  %v170_v17 = vpop.f32.mrb[2].mxu0 }
 0x13a   :  { %v173_v18 = vmul.f32 0.2, %v167_v14  ;;  %v171_v19 = vpop.f32.mrb[3].mxu0 }
 0x13b   :  { %v174_v20 = vmul.f32 0.2, %v169_v16 }
 0x13c   :  { %v175_v21 = vmax.f32 %v167_v14, %v173_v18 }
 0x13d   :  { %v176_v22 = vmax.f32 %v169_v16, %v174_v20 }
 0x13e   :  { %v177_v24 = vpack.c.bf16 %v175_v21, %v175_v21 }
 0x13f   :  { %v178_v23 = vpack.c.bf16 %v176_v22, %v176_v22 }
 0x141   :  { %595 = vmatprep.mubr.bf16.mxu1 %v178_v23  ;;  %636 = vmatprep.mubr.bf16.mxu0 %v178_v23 }
 0x142   :  { %596 = vmatmul.mubr.bf16.vlgmr.msra.gmra.mrb[0].mxu1 %v177_v24  ;;  %637 = vmatmul.mubr.bf16.vlgmr.msra.gmra.mrb[4].mxu0 %v177_v24 }
 0x143   :  { %1272 = vmatpush3.bf16.msra.mxu1 %v1433_v27  ;;  %1294 = vmatpush3.bf16.msra.mxu0 %v1434_v28 }
 0x144   :  { %1273 = vmatprep.subr.bf16.mxu1 %v1435_v29  ;;  %1295 = vmatprep.subr.bf16.mxu0 %v1436_v30 }
 0x147   :  { %1274 = vmatpush3.bf16.msra.mxu1 %v1437_v31  ;;  %1296 = vmatpush3.bf16.msra.mxu0 %v1438_v32 }
 0x148   :  { %1275 = vmatprep.subr.bf16.mxu1 %v1439_v33  ;;  %1297 = vmatprep.subr.bf16.mxu0 %v1440_v34 }
 0x14b   :  { %1276 = vmatpush3.bf16.msra.mxu1 %v1441_v35  ;;  %1298 = vmatpush3.bf16.msra.mxu0 %v1442_v36 }
 0x14c   :  { %1277 = vmatprep.subr.bf16.mxu1 %v1443_v37  ;;  %1299 = vmatprep.subr.bf16.mxu0 %v1444_v38 }
 0x14f   :  { %1278 = vmatpush3.bf16.msra.mxu1 %v1445_v39  ;;  %1300 = vmatpush3.bf16.msra.mxu0 %v1446_v40 }
 0x150   :  { %1279 = vmatprep.subr.bf16.mxu1 %v1447_v41  ;;  %1301 = vmatprep.subr.bf16.mxu0 %v1448_v42 }
 0x153   :  { %1280 = vmatpush3.bf16.msra.mxu1 %v1449_v43  ;;  %1302 = vmatpush3.bf16.msra.mxu0 %v1450_v44 }
 0x154   :  { %1281 = vmatprep.subr.bf16.mxu1 %v1451_v45  ;;  %1303 = vmatprep.subr.bf16.mxu0 %v1452_v46 }
 0x157   :  { %1282 = vmatpush3.bf16.msra.mxu1 %v1453_v47  ;;  %1304 = vmatpush3.bf16.msra.mxu0 %v1454_v48 }
 0x158   :  { %1283 = vmatprep.subr.bf16.mxu1 %v1455_v49  ;;  %1305 = vmatprep.subr.bf16.mxu0 %v1456_v50 }
 0x15b   :  { %1284 = vmatpush3.bf16.msra.mxu1 %v1457_v51  ;;  %1306 = vmatpush3.bf16.msra.mxu0 %v1458_v52 }
 0x15c   :  { %1285 = vmatprep.subr.bf16.mxu1 %v1459_v53  ;;  %1307 = vmatprep.subr.bf16.mxu0 %v1460_v54 }
 0x15f   :  { %1286 = vmatpush3.bf16.msra.mxu1 %v1461_v55  ;;  %1308 = vmatpush3.bf16.msra.mxu0 %v1462_v56 }
 0x215   :  { %v597_v57 = vpop.f32.mrb[0].mxu1  ;;  %v638_v58 = vpop.f32.mrb[4].mxu0 }
 0x216   :  { %v645_v59 = vrot.slane %v597_v57, 4  ;;  %v657_v60 = vrot.slane %v638_v58, 4  ;;  %v599_v61 = vpop.f32.mrb[1].mxu1  ;;  %v640_v62 = vpop.f32.mrb[5].mxu0 }
 0x217   :  { %v651_v63 = vrot.slane %v599_v61, 4  ;;  %v663_v0 = vrot.slane %v640_v62, 4  ;;  %v601_v1 = vpop.f32.mrb[2].mxu1  ;;  %v642_v2 = vpop.f32.mrb[6].mxu0 }
 0x218   :  { %v646_v3 = vadd.f32 %v645_v59, %v597_v57  ;;  %v658_v4 = vadd.f32 %v657_v60, %v638_v58  ;;  %v602_v5 = vpop.f32.mrb[3].mxu1  ;;  %v643_v6 = vpop.f32.mrb[7].mxu0 }
 0x219   :  { %v652_v9 = vadd.f32 %v651_v63, %v599_v61  ;;  %v664_v11 = vadd.f32 %v663_v0, %v640_v62 }
 0x21a   :  { %v647_v12 = vrot.slane %v646_v3, 2  ;;  %v659_v13 = vrot.slane %v658_v4, 2 }
 0x21b   :  { %v653_v14 = vrot.slane %v652_v9, 2  ;;  %v665_v15 = vrot.slane %v664_v11, 2 }
 0x21c   :  { %v648_v16 = vadd.f32 %v647_v12, %v646_v3  ;;  %v660_v17 = vadd.f32 %v659_v13, %v658_v4 }
 0x21d   :  { %v654_v18 = vadd.f32 %v653_v14, %v652_v9  ;;  %v666_v19 = vadd.f32 %v665_v15, %v664_v11  ;;  %v1625_v11 = vmov 1966171168  }
 0x21e   :  { %v649_v20 = vrot.slane %v648_v16, 1  ;;  %v661_v21 = vrot.slane %v660_v17, 1  ;;  %v725_v12 = vunpack.c.l.s4 %v1625_v11 }
 0x21f   :  { %v655_v22 = vrot.slane %v654_v18, 1  ;;  %v667_v23 = vrot.slane %v666_v19, 1 }
 0x220   :  { %v650_v24 = vadd.f32 %v649_v20, %v648_v16  ;;  %v662_v25 = vadd.f32 %v661_v21, %v660_v17  ;;  %v726_v13 = vunpack.c.0.s8 %v725_v12 }
 0x221   :  { %v656_v26 = vadd.f32 %v655_v22, %v654_v18  ;;  %v668_v27 = vadd.f32 %v667_v23, %v666_v19 }
 0x222   :  { %v670_v28 = vmul.f32 0.125, %v650_v24  ;;  %v672_v29 = vmul.f32 0.125, %v662_v25  ;;  %v729_v16 = vsub.s32 %v726_v13, %v1724_v7  ;;  %v89_v24 = vld [vmem:[#allocation10 + $0x1] ss:$4 sm:$0xf] }
 0x223   :  { %v671_v30 = vmul.f32 0.125, %v656_v26  ;;  %v673_v31 = vmul.f32 0.125, %v668_v27  ;;  %v91_v25 = vld [vmem:[#allocation10 + $0x2] ss:$4 sm:$0xf]  ;;  %v763_v27 = vsub.s32 3, %v1724_v7 }
 0x224   :  { %v1734_v32 = vsub.f32 %v597_v57, %v670_v28  ;;  %v1736_v33 = vsub.f32 %v638_v58, %v672_v29  ;;  %v759_v28 = vsub.s32 2, %v1724_v7 }
 0x225   :  { %v1738_v34 = vsub.f32 %v599_v61, %v671_v30  ;;  %v1740_v35 = vsub.f32 %v640_v62, %v673_v31  ;;  %v777_v30 = vrot.slane %v91_v25, %v1727_v8  ;;  %v781_v31 = vrot.slane %v91_v25, %v1730_v10 }
 0x226   :  { %v678_v36 = vmul.f32 %v1734_v32, %v1734_v32  ;;  %v680_v37 = vmul.f32 %v1736_v33, %v1736_v33 }
 0x227   :  { %v679_v38 = vmul.f32 %v1738_v34, %v1738_v34  ;;  %v681_v39 = vmul.f32 %v1740_v35, %v1740_v35 }
 0x228   :  { %v682_v40 = vrot.slane %v678_v36, 4  ;;  %v694_v41 = vrot.slane %v680_v37, 4 }
 0x229   :  { %v688_v42 = vrot.slane %v679_v38, 4  ;;  %v700_v43 = vrot.slane %v681_v39, 4 }
 0x22a   :  { %v683_v44 = vadd.f32 %v682_v40, %v678_v36  ;;  %v695_v45 = vadd.f32 %v694_v41, %v680_v37  ;;  %v789_v36 = vrot.slane %v91_v25, %v763_v27  ;;  %v785_v37 = vrot.slane %v91_v25, %v759_v28 }
 0x22b   :  { %v689_v46 = vadd.f32 %v688_v42, %v679_v38  ;;  %v701_v47 = vadd.f32 %v700_v43, %v681_v39 }
 0x22c   :  { %v684_v48 = vrot.slane %v683_v44, 2  ;;  %v696_v49 = vrot.slane %v695_v45, 2 }
 0x22d   :  { %v690_v50 = vrot.slane %v689_v46, 2  ;;  %v702_v51 = vrot.slane %v701_v47, 2 }
 0x22e   :  { %v685_v52 = vadd.f32 %v684_v48, %v683_v44  ;;  %v697_v53 = vadd.f32 %v696_v49, %v695_v45 }
 0x22f   :  { %v691_v54 = vadd.f32 %v690_v50, %v689_v46  ;;  %v703_v55 = vadd.f32 %v702_v51, %v701_v47 }
 0x230   :  { %v686_v56 = vrot.slane %v685_v52, 1  ;;  %v698_v57 = vrot.slane %v697_v53, 1 }
 0x231   :  { %v692_v58 = vrot.slane %v691_v54, 1  ;;  %v704_v59 = vrot.slane %v703_v55, 1 }
 0x232   :  { %v687_v60 = vadd.f32 %v686_v56, %v685_v52  ;;  %v699_v61 = vadd.f32 %v698_v57, %v697_v53  ;;  %v1238_v57 = vld [vmem:[#allocation10 + $0x3] ss:$0 sm:$0xff] }
 0x233   :  { %v693_v62 = vadd.f32 %v692_v58, %v691_v54  ;;  %v705_v63 = vadd.f32 %v704_v59, %v703_v55 }
 0x234   :  { %v706_v0 = vmul.f32 0.125, %v687_v60  ;;  %v708_v1 = vmul.f32 0.125, %v699_v61 }
 0x235   :  { %v707_v2 = vmul.f32 0.125, %v693_v62  ;;  %v709_v3 = vmul.f32 0.125, %v705_v63 }
 0x236   :  { %v710_v4 = vadd.f32 1e-05, %v706_v0  ;;  %v712_v5 = vadd.f32 1e-05, %v708_v1 }
 0x237   :  { %v711_v6 = vadd.f32 1e-05, %v707_v2  ;;  %v713_v9 = vadd.f32 1e-05, %v709_v3 }
 0x238   :  { %1463 = vrsqrt.f32 %v710_v4 }
 0x239   :  { %1465 = vrsqrt.f32 %v712_v5 }
 0x23a   :  { %1467 = vrsqrt.f32 %v711_v6 }
 0x23b   :  { %1469 = vrsqrt.f32 %v713_v9 }
 0x242   :  { %v1464_v14 = vpop.eup %1463 }
 0x243   :  { %v1466_v15 = vpop.eup %1465 }
 0x244   :  { %v1468_v17 = vpop.eup %1467 }
 0x245   :  { %v1470_v18 = vpop.eup %1469  ;;  %v722_v19 = vcombine.low %v1464_v14, %v1468_v17 }
 0x246   :  { %v723_v20 = vcombine.low %v1466_v15, %v1470_v18 }
 0x247   :  { %v730_v21 = vrot.slane %v722_v19, %v729_v16 }
 0x248   :  { %v737_v22 = vrot.slane %v723_v20, %v729_v16 }
 0x24a   :  { %v738_v23 = vcombine.low %v730_v21, %v737_v22 }
 0x24c   :  { %v745_v26 = vrot.slane %v738_v23, %v729_v16 }
 0x24e   :  { %v747_v29 = vmul.f32 %v745_v26, %v89_v24 }
 0x250   :  { %v764_v38 = vrot.slane %v747_v29, %v763_v27  ;;  %v756_v39 = vrot.slane %v747_v29, %v1730_v10  ;;  %v752_v40 = vrot.slane %v747_v29, %v1727_v8  ;;  %v760_v41 = vrot.slane %v747_v29, %v759_v28 }
 0x252   :  { %v772_v42 = vmul.f32 %v764_v38, %v1740_v35  ;;  %v770_v43 = vmul.f32 %v756_v39, %v1738_v34  ;;  %v769_v44 = vmul.f32 %v752_v40, %v1734_v32  ;;  %v771_v7 = vmul.f32 %v760_v41, %v1736_v33 }
 0x254   :  { %v795_v45 = vadd.f32 %v781_v31, %v770_v43  ;;  %v797_v46 = vadd.f32 %v789_v36, %v772_v42  ;;  %v794_v47 = vadd.f32 %v777_v30, %v769_v44  ;;  %v796_v48 = vadd.f32 %v785_v37, %v771_v7 }
 0x256   :  { %v799_v49 = vmul.f32 0.2, %v795_v45  ;;  %v801_v50 = vmul.f32 0.2, %v797_v46  ;;  %v798_v51 = vmul.f32 0.2, %v794_v47 }
 0x257   :  { %v800_v52 = vmul.f32 0.2, %v796_v48 }
 0x258   :  { %v803_v10 = vmax.f32 %v795_v45, %v799_v49  ;;  %v805_v53 = vmax.f32 %v797_v46, %v801_v50  ;;  %v802_v8 = vmax.f32 %v794_v47, %v798_v51 }
 0x259   :  { %v804_v54 = vmax.f32 %v796_v48, %v800_v52 }
 0x25a   :  { %v807_v55 = vpack.c.bf16 %v803_v10, %v803_v10  ;;  %v809_v35 = vpack.c.bf16 %v805_v53, %v805_v53  ;;  %v806_v56 = vpack.c.bf16 %v802_v8, %v802_v8 }
 0x25b   :  { %v808_v34 = vpack.c.bf16 %v804_v54, %v804_v54 }
 0x25c   :  { %1102 = vmatprep.mubr.bf16.mxu1 %v807_v55  ;;  %1142 = vmatprep.mubr.bf16.mxu0 %v809_v35 }
 0x25d   :  { %1103 = vmatmul.mubr.bf16.vlgmr.msra.gmra.mrb[4].mxu1 %v806_v56  ;;  %1143 = vmatmul.mubr.bf16.vlgmr.msra.gmra.mrb[8].mxu0 %v808_v34 }
 0x330   :  { %v1287_v32 = vpop.f32.mrb[4].mxu1  ;;  %v1309_v33 = vpop.f32.mrb[8].mxu0 }
 0x331   :  { %v1288_v58 = vpop.f32.mrb[5].mxu1  ;;  %v1310_v59 = vpop.f32.mrb[9].mxu0 }
 0x332   :  { %v1289_v60 = vadd.f32 %v1288_v58, %v1287_v32  ;;  %v1311_v61 = vadd.f32 %v1310_v59, %v1309_v33  ;;  %v1290_v62 = vpop.f32.mrb[6].mxu1  ;;  %v1312_v63 = vpop.f32.mrb[10].mxu0 }
 0x333   :  { %v1291_v0 = vpop.f32.mrb[7].mxu1  ;;  %v1313_v1 = vpop.f32.mrb[11].mxu0 }
 0x334   :  { %v1105_v2 = vadd.f32 %v1289_v60, %v1238_v57 }
 0x336   :  { %v1145_v3 = vadd.f32 %v1311_v61, %v1105_v2 }
 0x338   :  { %1471 = vtanh.f32 %v1145_v3 }
 0x342   :  { %v1472_v4 = vpop.eup %1471 }
 0x343   :  { %1151 = vst [vmem:[#allocation11] sm:$0xff] %v1472_v4 }
 0x344   :  { %1594 = shalt.err (!%p1591_p2)
}
 0x345   :  { %s1595_s7 = scalar_lea.hbm %s1778_s5, 128 }
 0x346   :  { %p1596_p3 = scmp.ne.s32.totalorder %s1778_s5, %s1595_s7  ;;  %p1599_p4 = scmp.lt.u32.totalorder %s1595_s7, %s1778_s5 }
 0x348   :  { %p1601_p5 = pnand %p1599_p4, %p1596_p3 }
 0x34a   :  { %1604 = shalt.err (!%p1601_p5)
}
 0x34b   :  { %1161 = dma.vmem_to_hbm [thread:$0]  %s1159_s29, 128, %s1778_s5, [#allocation4]  }
 0x34c   :  { %1611 = dma.done.wait [#allocation4], 128  }
 0x34d   :  { %1612 = vsyncadd [#allocation4], 4294967168 }
 0x34e   :  { %1165 = vsyncpa [#allocation3], 1 }
 0x34f   :  { %1166 = vsyncpa [#allocation6], 1 }
 0x350   :  { %1167 = vsyncpa [#allocation9], 1 }
 0x351   :  { %1168 = vsyncpa [#allocation4], 1 }

</bundles_post_ra>
